<compile_context>
chip_gen: v7x
topology: tpu7x:2x2x1
jax: 0.10.0
libtpu: 0.0.40
codegen_flags: <defaults>
</compile_context>

<pallas_src>
import jax
import jax.numpy as jnp
from jax.experimental import pallas as pl
from jax.experimental.pallas import tpu as pltpu


def _gate_combine_kernel(b_eff_ref, f_ref, a_ref, q_ref, w_eff_ref, out_ref):
    # b_eff_ref: SMEM (2,) f32 scalars [b_eff_f, b_eff_a]
    # f/a/q/out: (TB, H) batch tile
    # w_eff_ref: (2, H) f32 fused weights, resident across grid steps
    f = f_ref[...].astype(jnp.float32)
    a = a_ref[...].astype(jnp.float32)
    q = q_ref[...].astype(jnp.float32)

    w = w_eff_ref[...]            # (2, H)
    wf_row = w[0:1, :]            # (1, H) broadcasts over batch rows
    wa_row = w[1:2, :]

    # Gate logits: VPU multiply + XLU lane reduction (no N=1 MXU matmul).
    f_logit = jnp.sum((f + q) * wf_row, axis=-1, keepdims=True) + b_eff_ref[0]
    a_logit = jnp.sum((a + q) * wa_row, axis=-1, keepdims=True) + b_eff_ref[1]

    f_g = jax.nn.sigmoid(f_logit)  # (TB, 1); exp lowers to the (otherwise idle) EUP
    a_g = jax.nn.sigmoid(a_logit)  # (TB, 1)

    out_ref[...] = (f_g * f + a_g * a + q).astype(out_ref.dtype)


def _fuse_params(params):
    """Collapse the two stacked linears per branch (exact in eval mode)."""
    hi = jax.lax.Precision.HIGHEST
    f32 = jnp.float32
    wf = params["wf"].astype(f32)
    wa = params["wa"].astype(f32)
    wfa = params["wfa"].astype(f32)
    waa = params["waa"].astype(f32)
    w_eff_f = jnp.matmul(wf, wfa, precision=hi).reshape(-1)          # (H,)
    w_eff_a = jnp.matmul(wa, waa, precision=hi).reshape(-1)          # (H,)
    b_eff_f = (jnp.matmul(params["bf"].astype(f32), wfa, precision=hi)
               + params["bfa"].astype(f32)).reshape(())
    b_eff_a = (jnp.matmul(params["ba"].astype(f32), waa, precision=hi)
               + params["baa"].astype(f32)).reshape(())
    w_eff = jnp.stack([w_eff_f, w_eff_a], axis=0)                    # (2, H)
    b_eff = jnp.stack([b_eff_f, b_eff_a])                            # (2,)
    return w_eff, b_eff


def gate_combine_three(f, a, q, params, *, block_b=512):
    """f, a, q: [B, hidden]; params: dict of pre-transposed weights/biases."""
    B, H = f.shape
    w_eff, b_eff = _fuse_params(params)

    # Batch tile: multiple of 8 sublanes (or the full batch for small B).
    tb = min(block_b, B)
    if tb != B and tb % 8 != 0:
        tb = B
    grid = (pl.cdiv(B, tb),)

    kernel = pl.pallas_call(
        _gate_combine_kernel,
        out_shape=jax.ShapeDtypeStruct((B, H), f.dtype),
        grid_spec=pltpu.PrefetchScalarGridSpec(
            num_scalar_prefetch=1,                      # b_eff -> SMEM scalars
            grid=grid,
            in_specs=[
                pl.BlockSpec((tb, H), lambda i, b: (i, 0)),   # f
                pl.BlockSpec((tb, H), lambda i, b: (i, 0)),   # a
                pl.BlockSpec((tb, H), lambda i, b: (i, 0)),   # q
                pl.BlockSpec((2, H), lambda i, b: (0, 0)),    # fused weights (resident)
            ],
            out_specs=pl.BlockSpec((tb, H), lambda i, b: (i, 0)),
        ),
        compiler_params=pltpu.CompilerParams(
            dimension_semantics=("parallel",),
        ),
    )
    return kernel(b_eff, f, a, q, w_eff)


def _ref_forward(f, a, q, params):
    """Pure-JAX reference matching the PyTorch module (eval mode), un-fused."""
    hi = jax.lax.Precision.HIGHEST
    f32 = jnp.float32
    f_proj = jnp.matmul((f + q).astype(f32), params["wf"], precision=hi) + params["bf"]
    f_g = jax.nn.sigmoid(jnp.matmul(f_proj, params["wfa"], precision=hi) + params["bfa"])
    a_proj = jnp.matmul((a + q).astype(f32), params["wa"], precision=hi) + params["ba"]
    a_g = jax.nn.sigmoid(jnp.matmul(a_proj, params["waa"], precision=hi) + params["baa"])
    return f_g * f + a_g * a + q


def init_params(key, hidden, mid, dtype=jnp.float32):
    ks = jax.random.split(key, 8)
    s_h = 1.0 / jnp.sqrt(hidden)
    s_m = 1.0 / jnp.sqrt(mid)
    # nn.Linear(hidden, mid): weight (mid, hidden) -> stored transposed (hidden, mid)
    return {
        "wf": (jax.random.uniform(ks[0], (hidden, mid), dtype, -1, 1) * s_h),
        "bf": (jax.random.uniform(ks[1], (1, mid), dtype, -1, 1) * s_h),
        "wa": (jax.random.uniform(ks[2], (hidden, mid), dtype, -1, 1) * s_h),
        "ba": (jax.random.uniform(ks[3], (1, mid), dtype, -1, 1) * s_h),
        # nn.Linear(mid, 1): weight (1, mid) -> stored transposed (mid, 1)
        "wfa": (jax.random.uniform(ks[4], (mid, 1), dtype, -1, 1) * s_m),
        "bfa": (jax.random.uniform(ks[5], (1, 1), dtype, -1, 1) * s_m),
        "waa": (jax.random.uniform(ks[6], (mid, 1), dtype, -1, 1) * s_m),
        "baa": (jax.random.uniform(ks[7], (1, 1), dtype, -1, 1) * s_m),
    }


if __name__ == "__main__":
    B, hidden, mid = 16, 32, 16

    key = jax.random.PRNGKey(0)
    kf, ka, kq, kp = jax.random.split(key, 4)
    f = jax.random.normal(kf, (B, hidden), jnp.float32)
    a = jax.random.normal(ka, (B, hidden), jnp.float32)
    q = jax.random.normal(kq, (B, hidden), jnp.float32)
    params = init_params(kp, hidden, mid)

    # block_b=8 exercises the batch grid (grid=(2,)) even at this tiny demo size.
    out = gate_combine_three(f, a, q, params, block_b=8)
    out = jax.block_until_ready(out)

    ref = _ref_forward(f, a, q, params)
    assert out.shape == (B, hidden)
    assert jnp.allclose(out, ref, atol=2e-5, rtol=2e-5), "mismatch vs reference"

    print("KERNEL_OK")
</pallas_src>

<mosaic_0001>
module attributes {stable_mosaic.version = 11 : i64} {
  func.func @_gate_combine_kernel(%arg0: i32, %arg1: memref<2xf32, #tpu.memory_space<smem>>, %arg2: memref<8x32xf32, #tpu.memory_space<vmem>>, %arg3: memref<8x32xf32, #tpu.memory_space<vmem>>, %arg4: memref<8x32xf32, #tpu.memory_space<vmem>>, %arg5: memref<2x32xf32, #tpu.memory_space<vmem>>, %arg6: memref<8x32xf32, #tpu.memory_space<vmem>>) attributes {dimension_semantics = [#tpu.dimension_semantics<parallel>], iteration_bounds = array<i64: 2>, scalar_prefetch = 1 : i64, scratch_operands = 0 : i64, tpu.core_type = #tpu.core_type<tc>, window_params = [{transform_indices = @transform_0, window_bounds = array<i64: 8, 32>}, {transform_indices = @transform_1, window_bounds = array<i64: 8, 32>}, {transform_indices = @transform_2, window_bounds = array<i64: 8, 32>}, {pipeline_mode = #tpu.pipeline_mode<synchronous>, transform_indices = @transform_3, window_bounds = array<i64: 2, 32>}, {transform_indices = @transform_4, window_bounds = array<i64: 8, 32>}]} {
    %c0 = arith.constant 0 : index
    %c0_0 = arith.constant 0 : index
    %0 = vector.load %arg2[%c0, %c0_0] : memref<8x32xf32, #tpu.memory_space<vmem>>, vector<8x32xf32>
    %c0_1 = arith.constant 0 : index
    %c0_2 = arith.constant 0 : index
    %1 = vector.load %arg3[%c0_1, %c0_2] : memref<8x32xf32, #tpu.memory_space<vmem>>, vector<8x32xf32>
    %c0_3 = arith.constant 0 : index
    %c0_4 = arith.constant 0 : index
    %2 = vector.load %arg4[%c0_3, %c0_4] : memref<8x32xf32, #tpu.memory_space<vmem>>, vector<8x32xf32>
    %c0_5 = arith.constant 0 : index
    %c0_6 = arith.constant 0 : index
    %3 = vector.load %arg5[%c0_5, %c0_6] : memref<2x32xf32, #tpu.memory_space<vmem>>, vector<2x32xf32>
    %4 = vector.extract_strided_slice %3 {offsets = [0, 0], sizes = [1, 32], strides = [1, 1]} : vector<2x32xf32> to vector<1x32xf32>
    %5 = vector.extract_strided_slice %3 {offsets = [1, 0], sizes = [1, 32], strides = [1, 1]} : vector<2x32xf32> to vector<1x32xf32>
    %6 = arith.addf %0, %2 : vector<8x32xf32>
    %7 = vector.broadcast %4 : vector<1x32xf32> to vector<8x32xf32>
    %8 = arith.mulf %6, %7 : vector<8x32xf32>
    %cst = arith.constant dense<0.000000e+00> : vector<8xf32>
    %9 = vector.multi_reduction <add>, %8, %cst [1] : vector<8x32xf32> to vector<8xf32>
    %10 = vector.shape_cast %9 : vector<8xf32> to vector<8x1xf32>
    %c0_7 = arith.constant 0 : index
    %11 = memref.load %arg1[%c0_7] : memref<2xf32, #tpu.memory_space<smem>>
    %12 = vector.broadcast %11 : f32 to vector<8x1xf32>
    %13 = arith.addf %10, %12 : vector<8x1xf32>
    %14 = arith.addf %1, %2 : vector<8x32xf32>
    %15 = vector.broadcast %5 : vector<1x32xf32> to vector<8x32xf32>
    %16 = arith.mulf %14, %15 : vector<8x32xf32>
    %cst_8 = arith.constant dense<0.000000e+00> : vector<8xf32>
    %17 = vector.multi_reduction <add>, %16, %cst_8 [1] : vector<8x32xf32> to vector<8xf32>
    %18 = vector.shape_cast %17 : vector<8xf32> to vector<8x1xf32>
    %c1 = arith.constant 1 : index
    %19 = memref.load %arg1[%c1] : memref<2xf32, #tpu.memory_space<smem>>
    %20 = vector.broadcast %19 : f32 to vector<8x1xf32>
    %21 = arith.addf %18, %20 : vector<8x1xf32>
    %22 = arith.negf %13 : vector<8x1xf32>
    %23 = math.exp %22 : vector<8x1xf32>
    %cst_9 = arith.constant 1.000000e+00 : f32
    %24 = vector.broadcast %cst_9 : f32 to vector<8x1xf32>
    %25 = arith.addf %24, %23 : vector<8x1xf32>
    %26 = arith.divf %24, %25 : vector<8x1xf32>
    %27 = arith.negf %21 : vector<8x1xf32>
    %28 = math.exp %27 : vector<8x1xf32>
    %cst_10 = arith.constant 1.000000e+00 : f32
    %29 = vector.broadcast %cst_10 : f32 to vector<8x1xf32>
    %30 = arith.addf %29, %28 : vector<8x1xf32>
    %31 = arith.divf %29, %30 : vector<8x1xf32>
    %32 = vector.broadcast %26 : vector<8x1xf32> to vector<8x32xf32>
    %33 = arith.mulf %32, %0 : vector<8x32xf32>
    %34 = vector.broadcast %31 : vector<8x1xf32> to vector<8x32xf32>
    %35 = arith.mulf %34, %1 : vector<8x32xf32>
    %36 = arith.addf %33, %35 : vector<8x32xf32>
    %37 = arith.addf %36, %2 : vector<8x32xf32>
    %c0_11 = arith.constant 0 : index
    %c0_12 = arith.constant 0 : index
    %38 = vector.load %arg6[%c0_11, %c0_12] : memref<8x32xf32, #tpu.memory_space<vmem>>, vector<8x32xf32>
    tpu.vector_store %arg6[%c0_11, %c0_12], %37 {strides = array<i32>} : memref<8x32xf32, #tpu.memory_space<vmem>>, vector<8x32xf32>,
    return
  }
  func.func @transform_0(%arg0: i32, %arg1: memref<2xf32, #tpu.memory_space<smem>>) -> (i32, i32) {
    %c0_i32 = arith.constant 0 : i32
    %c0_i32_0 = arith.constant 0 : i32
    return %arg0, %c0_i32 : i32, i32
  }
  func.func @transform_1(%arg0: i32, %arg1: memref<2xf32, #tpu.memory_space<smem>>) -> (i32, i32) {
    %c0_i32 = arith.constant 0 : i32
    %c0_i32_0 = arith.constant 0 : i32
    return %arg0, %c0_i32 : i32, i32
  }
  func.func @transform_2(%arg0: i32, %arg1: memref<2xf32, #tpu.memory_space<smem>>) -> (i32, i32) {
    %c0_i32 = arith.constant 0 : i32
    %c0_i32_0 = arith.constant 0 : i32
    return %arg0, %c0_i32 : i32, i32
  }
  func.func @transform_3(%arg0: i32, %arg1: memref<2xf32, #tpu.memory_space<smem>>) -> (i32, i32) {
    %c0_i32 = arith.constant 0 : i32
    %c0_i32_0 = arith.constant 0 : i32
    %c0_i32_1 = arith.constant 0 : i32
    return %c0_i32, %c0_i32_0 : i32, i32
  }
  func.func @transform_4(%arg0: i32, %arg1: memref<2xf32, #tpu.memory_space<smem>>) -> (i32, i32) {
    %c0_i32 = arith.constant 0 : i32
    %c0_i32_0 = arith.constant 0 : i32
    return %arg0, %c0_i32 : i32, i32
  }
}

</mosaic_0001>

<bundles_post_ra>
// kernel: tpu_custom_call.1
= control target key start
LH: loop header
LB: loop body
LE: loop exit
PB: predicated region body
PF: predicated region fallthrough
CT: control target
= control target key end

     0   :  { %s1010_s0 = inlined_call_operand.hbm [shape: f32[2], index: 0, kind: input, shape index: {}]   ;;  %s1011_s1 = inlined_call_operand.hbm [shape: f32[16,32], index: 1, kind: input, shape index: {}]   ;;  %s1012_s2 = inlined_call_operand.hbm [shape: f32[16,32], index: 2, kind: input, shape index: {}]   ;;  %s1013_s3 = inlined_call_operand.hbm [shape: f32[16,32], index: 3, kind: input, shape index: {}]   ;;  %s1014_s4 = inlined_call_operand.vmem [shape: f32[2,32], index: 4, kind: input, shape index: {}]   ;;  %s1015_s5 = inlined_call_operand.hbm [shape: f32[16,32], index: 5, kind: output, shape index: {}]  }
   0x1   :  { %1020 = sst [smem:[#allocation16_spill]] %s1012_s2  ;;  %s548_s20 = scalar_lea.hbm %s1010_s0, 16 }
   0x2   :  { %p549_p0 = scmp.ne.s32.totalorder %s1010_s0, %s548_s20  ;;  %p552_p1 = scmp.lt.u32.totalorder %s548_s20, %s1010_s0 }
   0x4   :  { %p554_p2 = pnand %p552_p1, %p549_p0 }
   0x6   :  { %557 = shalt.err (!%p554_p2)  }
   0x7   :  { %s722_s25 = smov [#allocation3]  }
   0x8   :  { %11 = dma.hbm_to_smem %s1010_s0, 16, %s722_s25, [#allocation2] }
   0x9   :  { %692 = dma.done.wait [#allocation2], 16 }
   0xa   :  { %693 = vsyncadd [#allocation2], 4294967280 }
   0xb   :  { %13 = sfence }
   0xc   :  { %14 = vsyncpa [#allocation5], 0 }
   0xd   :  { %16 = vsyncpa [#allocation5 + $0x1], 0 }
   0xe   :  { %17 = vsyncpa [#allocation8], 0 }
   0xf   :  { %19 = vsyncpa [#allocation8 + $0x1], 0 }
  0x10   :  { %20 = vsyncpa [#allocation6], 0 }
  0x11   :  { %22 = vsyncpa [#allocation6 + $0x1], 0  ;;  %s769_s28 = smov 0   ;;  %s771_s29 = smov 0  }
  0x12   :  { %s773_s30 = smov 0   ;;  %s775_s6 = smov 0  }
  0x13 LB: > { %s790_s0 = sadd.s32 4294967295, %s720_s6   ;;  %s462_s7 = sadd.s32 4294967294, %s720_s6   ;;  %s720_s6 = sphi %s775_s6, %s1041_s6   ;;  %s716_s30 = sphi %s773_s30, %s1040_s30   ;;  %s712_s29 = sphi %s771_s29, %s1039_s29   ;;  %s708_s28 = sphi %s769_s28, %s1038_s28  }
  0x14   : > { %s794_s8 = sadd.s32 1, %s720_s6   ;;  %s35_s9 = sadd.s32 1, %s716_s30 }
  0x15   : > { %s32_s10 = ssub.s32 %s720_s6, %s794_s8  ;;  %p42_p3 = scmp.ne.s32.totalorder %s716_s30, %s712_s29 }
  0x16   : > { %p33_p4 = scmp.eq.s32.totalorder %s32_s10, 0  ;;  %p43_p5 = scmp.eq.s32.totalorder %s720_s6, 0 }
  0x17   : > { %p48_p6 = scmp.ne.s32.totalorder %s712_s29, %s708_s28  ;;  %p49_p7 = scmp.eq.s32.totalorder %s790_s0, 0 }
  0x18   : > { %s806_s11 = scalar_select %p33_p4, %s716_s30, %s35_s9  }
  0x19   : > { %p44_p8 = por %p43_p5, %p42_p3  ;;  %p808_p9 = por %p49_p7, %p48_p6 }
  0x1a   : > { %1021 = sst [smem:[#allocation15_spill]] %s806_s11  ;;  %p145_p10 = scmp.eq.s32.totalorder %s790_s0, 1 }
  0x1b   : > { %s1022_s12 = scalar_select %p808_p9, 1, 0 }
  0x1c   : > { %p151_p11 = scmp.eq.s32.totalorder %s462_s7, 1  ;;  %p505_p13 = scmp.lt.s32.totalorder %s720_s6, 2 }
  0x1d   : > { %p815_p0 = por %p145_p10, %p42_p3  ;;  %s174_s15 = sand.u32 1, %s716_s30  }
  0x1e   : > { %p819_p1 = por %p151_p11, %p48_p6  ;;  %s825_s16 = sshll.u32 %s720_s6, 7 }
  0x1f   : > { %s1023_s13 = scalar_select %p815_p0, 1, 0 }
  0x20   : > { %s1024_s14 = scalar_select %p819_p1, 1, 0 }
  0x21   : > { %s829_s17 = sshll.u32 %s174_s15, 3  ;;  %p831_p2 = pnand %p505_p13, %p44_p8 }
  0x22   : > { %s192_s19 = sand.u32 1, %s720_s6   ;;  %s1026_s2 = sld [smem:[#allocation16_spill]] }
  0x23   : > { %s1025_s18 = scalar_select %p831_p2, 1, 0 }
  0x24   : > { %s196_s23 = scalar_lea.vmem [#allocation7], %s829_s17  ;;  %s846_s25 = scalar_lea.sflag [#allocation8], %s192_s19 }
  0x25   : > { %s203_s24 = sshll.u32 %s196_s23, 4  ;;  %p852_p5 = pneg %p831_p2  ;;  %s843_s24 = int_to_ptr.vmem [resolvable:$true] %s203_s24 }
  0x28   : > { %s840_s22 = scalar_lea.hbm %s1026_s2, %s825_s16  ;;  %s563_s10 = scalar_lea.hbm %s1026_s2, 256 }
  0x29   : > { %s558_s26 = scalar_lea.hbm %s840_s22, 128  ;;  %p564_p8 = scmp.lt.u32.totalorder %s840_s22, %s1026_s2 }
  0x2a   : > { %p559_p4 = scmp.ne.s32.totalorder %s840_s22, %s558_s26  ;;  %p565_p10 = scmp.lt.u32.totalorder %s563_s10, %s558_s26 }
  0x2b   : > { %p567_p13 = scmp.lt.u32.totalorder %s558_s26, %s840_s22 }
  0x2c   : > { %p561_p6 = pnand %p852_p5, %p559_p4  ;;  %p566_p11 = por %p565_p10, %p564_p8 }
  0x2e   : > { %p562_p7 = pneg %p561_p6  ;;  %p568_p12 = por %p567_p13, %p566_p11 }
  0x30   : > { %p569_p3 = pnand %p568_p12, %p562_p7 }
  0x32   : > { %572 = shalt.err (!%p569_p3)
}
  0x33   : > { %s573_s19 = scalar_lea.vmem %s843_s24, 128  ;;  %s723_s23 = smov [#allocation7]  }
  0x34   : > { %p574_p4 = scmp.ne.s32.totalorder %s843_s24, %s573_s19  ;;  %s578_s7 = sshll.u32 %s723_s23, 4  ;;  %s579_s7 = int_to_ptr.vmem [resolvable:$false] %s578_s7 }
  0x35   : > { %s580_s9 = scalar_lea.vmem %s579_s7, 256  ;;  %p581_p0 = scmp.lt.s32.totalorder %s843_s24, %s579_s7 }
  0x36   : > { %p576_p6 = pnand %p574_p4, %p852_p5  ;;  %p582_p9 = scmp.lt.s32.totalorder %s580_s9, %s573_s19 }
  0x38   : > { %p577_p1 = pneg %p576_p6  ;;  %p583_p8 = por %p582_p9, %p581_p0 }
  0x3a   : > { %p584_p10 = pnand %p583_p8, %p577_p1 }
  0x3c   : > { %587 = shalt.err (!%p584_p10)
}
  0x3d   : > { %497 = dma.hbm_to_vmem [thread:$0]  (!%p831_p2), %s840_s22, 128, %s843_s24, %s846_s25  }
  0x3e   : > { %p226_p12 = scmp.lt.s32.totalorder %s720_s6, 3  ;;  %s881_s20 = scalar_lea.hbm %s1011_s1, %s825_s16 }
  0x3f   : > { %p1028_p9 = scmp.ge.s32.totalorder %s720_s6, 1  ;;  %s178_s19 = scalar_lea.vmem [#allocation4], %s829_s17 }
  0x40   : > { %s185_s23 = sshll.u32 %s178_s19, 4  ;;  %s175_s22 = scalar_lea.sflag [#allocation5], %s174_s15  ;;  %s186_s23 = int_to_ptr.vmem [resolvable:$true] %s185_s23 }
  0x41   : > { %p885_p0 = pnand %p1028_p9, %p226_p12  ;;  %s588_s24 = scalar_lea.hbm %s881_s20, 128 }
  0x42   : > { %p589_p1 = scmp.ne.s32.totalorder %s881_s20, %s588_s24  ;;  %s593_s26 = scalar_lea.hbm %s1011_s1, 256 }
  0x43   : > { %s1029_s21 = scalar_select %p885_p0, 1, 0 }
  0x44   : > { %p591_p3 = pnand %p589_p1, %p852_p5  ;;  %p594_p11 = scmp.lt.u32.totalorder %s881_s20, %s1011_s1 }
  0x45   : > { %p595_p13 = scmp.lt.u32.totalorder %s593_s26, %s588_s24  ;;  %p597_p6 = scmp.lt.u32.totalorder %s588_s24, %s881_s20 }
  0x46   : > { %p592_p7 = pneg %p591_p3 }
  0x47   : > { %p596_p4 = por %p595_p13, %p594_p11 }
  0x49   : > { %p598_p8 = por %p597_p6, %p596_p4 }
  0x4b   : > { %p599_p10 = pnand %p598_p8, %p592_p7 }
  0x4d   : > { %602 = shalt.err (!%p599_p10)
}
  0x4e   : > { %s603_s15 = scalar_lea.vmem %s186_s23, 128  ;;  %s724_s19 = smov [#allocation4]  }
  0x4f   : > { %p604_p12 = scmp.ne.s32.totalorder %s186_s23, %s603_s15  ;;  %s608_s11 = sshll.u32 %s724_s19, 4  ;;  %s609_s11 = int_to_ptr.vmem [resolvable:$false] %s608_s11 }
  0x50   : > { %s610_s7 = scalar_lea.vmem %s609_s11, 256  ;;  %p611_p3 = scmp.lt.s32.totalorder %s186_s23, %s609_s11 }
  0x51   : > { %p606_p9 = pnand %p604_p12, %p852_p5  ;;  %p612_p0 = scmp.lt.s32.totalorder %s610_s7, %s603_s15 }
  0x53   : > { %p607_p1 = pneg %p606_p9  ;;  %p613_p2 = por %p612_p0, %p611_p3 }
  0x55   : > { %p614_p11 = pnand %p613_p2, %p607_p1 }
  0x57   : > { %617 = shalt.err (!%p614_p11)
}
  0x58   : > { %p1030_p13 = scmp.ne.s32.totalorder %s1025_s18, 0  ;;  %s913_s9 = scalar_lea.hbm %s1013_s3, %s825_s16 }
  0x59   : > { %s214_s11 = scalar_lea.vmem [#allocation9], %s829_s17  ;;  %s618_s10 = scalar_lea.hbm %s913_s9, 128 }
  0x5a   : > { %494 = dma.hbm_to_vmem [thread:$0]  (!%p1030_p13), %s881_s20, 128, %s186_s23, %s175_s22  }
  0x5b   : > { %s221_s26 = sshll.u32 %s214_s11, 4  ;;  %p619_p2 = scmp.ne.s32.totalorder %s913_s9, %s618_s10  ;;  %s222_s26 = int_to_ptr.vmem [resolvable:$true] %s221_s26 }
  0x5c   : > { %s623_s20 = scalar_lea.hbm %s1013_s3, 256  ;;  %p624_p4 = scmp.lt.u32.totalorder %s913_s9, %s1013_s3 }
  0x5d   : > { %p621_p0 = pnand %p619_p2, %p852_p5  ;;  %p625_p6 = scmp.lt.u32.totalorder %s623_s20, %s618_s10 }
  0x5e   : > { %p627_p10 = scmp.lt.u32.totalorder %s618_s10, %s913_s9 }
  0x5f   : > { %p622_p7 = pneg %p621_p0  ;;  %p626_p8 = por %p625_p6, %p624_p4 }
  0x61   : > { %p628_p12 = por %p627_p10, %p626_p8 }
  0x63   : > { %p629_p9 = pnand %p628_p12, %p622_p7 }
  0x65   : > { %632 = shalt.err (!%p629_p9)
}
  0x66   : > { %s633_s16 = scalar_lea.vmem %s222_s26, 128  ;;  %s725_s17 = smov [#allocation9]  }
  0x67   : > { %p634_p1 = scmp.ne.s32.totalorder %s222_s26, %s633_s16  ;;  %s638_s7 = sshll.u32 %s725_s17, 4  ;;  %s639_s7 = int_to_ptr.vmem [resolvable:$false] %s638_s7 }
  0x68   : > { %s640_s2 = scalar_lea.vmem %s639_s7, 256  ;;  %p641_p2 = scmp.lt.s32.totalorder %s222_s26, %s639_s7 }
  0x69   : > { %p636_p3 = pnand %p634_p1, %p852_p5  ;;  %p642_p0 = scmp.lt.s32.totalorder %s640_s2, %s633_s16 }
  0x6b   : > { %p637_p11 = pneg %p636_p3  ;;  %p643_p13 = por %p642_p0, %p641_p2 }
  0x6d   : > { %p644_p4 = pnand %p643_p13, %p637_p11 }
  0x6f   : > { %647 = shalt.err (!%p644_p4)
}
  0x70   : > { %p1031_p6 = scmp.ne.s32.totalorder %s1025_s18, 0  ;;  %p1032_p7 = scmp.ne.s32.totalorder %s1029_s21, 0 }
  0x71   : > { %s937_s27 = sand.u32 (!%p1032_p7), 1, %s712_s29   ;;  %p1033_p5 = scmp.ne.s32.totalorder (!%p1032_p7), %s1022_s12, 0 }
  0x72   : > { %500 = dma.hbm_to_vmem [thread:$0]  (!%p1031_p6), %s913_s9, 128, %s222_s26, %s846_s25  }
  0x73   : > { %230 = sbr.rel (%p1032_p7) target bundleno = 331 (0x14b), region = 36  ;;  %s940_s24 = sshll.u32 (!%p1032_p7), %s937_s27, 3 }
  0x74   : > { %s233_s11 = scalar_lea.sflag (!%p1032_p7), [#allocation5], %s937_s27  ;;  %s236_s10 = scalar_lea.vmem (!%p1032_p7), [#allocation4], %s940_s24 }
  0x7a   : > { %695 = dma.done.wait (%p1033_p5), %s233_s11, 128  }
  0x7b   : > { %697 = vsyncadd (%p1033_p5), %s233_s11, 4294967168  ;;  %s241_s18 = sand.u32 1, %s790_s0   ;;  %s245_s21 = scalar_lea.vmem [#allocation7], %s940_s24 }
  0x7c   : > { %s242_s25 = scalar_lea.sflag [#allocation8], %s241_s18 }
  0x7d   : > { %699 = dma.done.wait (%p1033_p5), %s242_s25, 256  }
  0x7e   : > { %701 = vsyncadd (%p1033_p5), %s242_s25, 4294967040  ;;  %v294_v0 = vlaneseq  ;;  %v289_v4 = vld [vmem:[%s236_s10] sm:$0xff]  ;;  %s254_s9 = scalar_lea.vmem [#allocation9], %s940_s24  ;;  %v292_v6 = vld [vmem:[%s1014_s4] sm:$0x3]  ;;  %vm299_vm0 = vcmask 261120  }
  0x7f   : > { %v291_v5 = vld [vmem:[%s254_s9] sm:$0xff]  ;;  %v290_v9 = vld [vmem:[%s245_s21] sm:$0xff]  ;;  %s303_s12 = sld [smem:[#allocation3]]  ;;  %s476_s19 = sld [smem:[#allocation3 + $0x1]] }
  0x80   : > { %v295_v1 = vshrl.u32 %v294_v0, 7  ;;  %v293_v7 = vadd.f32 %v291_v5, %v289_v4  ;;  %v306_v11 = vadd.f32 %v291_v5, %v290_v9  ;;  %s480_s20 = sshll.u32 %s790_s0, 7  ;;  %s288_s23 = scalar_lea.vmem [#allocation10], %s940_s24 }
  0x81   : > { %s349_s22 = sshll.u32 %s288_s23, 4  ;;  %s965_s7 = scalar_lea.hbm %s1015_s5, %s480_s20  ;;  %s967_s22 = int_to_ptr.vmem [resolvable:$true] %s349_s22 }
  0x82   : > { %v296_v2 = vsub.s32 0, %v295_v1  ;;  %v309_v3 = vsub.s32 1, %v295_v1  ;;  %s336_s2 = scalar_lea.sflag [#allocation6], %s937_s27  ;;  %s648_s11 = scalar_lea.vmem %s967_s22, 128 }
  0x83   : > { %p649_p13 = scmp.ne.s32.totalorder %s967_s22, %s648_s11  ;;  %p1034_p8 = scmp.ne.s32.totalorder %s1023_s13, 0 }
  0x84   : > { %v297_v8 = vrot.slane %v292_v6, %v296_v2  ;;  %v310_v10 = vrot.slane %v292_v6, %v309_v3  ;;  %s726_s0 = smov [#allocation10]  }
  0x85   : > { %v304_v16 = vstv %s303_s12  ;;  %v316_v19 = vstv %s476_s19  ;;  %p650_p10 = pnand %p649_p13, %p1034_p8  ;;  %s652_s24 = sshll.u32 %s726_s0, 4  ;;  %s653_s24 = int_to_ptr.vmem [resolvable:$false] %s652_s24 }
  0x86   : > { %v298_v12 = vmul.f32 %v297_v8, %v293_v7  ;;  %v311_v13 = vmul.f32 %v310_v10, %v306_v11  ;;  %s654_s10 = scalar_lea.vmem %s653_s24, 256  ;;  %p655_p9 = scmp.lt.s32.totalorder %s967_s22, %s653_s24 }
  0x87   : > { %p651_p12 = pneg %p650_p10  ;;  %p656_p1 = scmp.lt.s32.totalorder %s654_s10, %s648_s11 }
  0x88   : > { %v300_v14 = vsel %vm299_vm0, %v298_v12, 0.0  ;;  %v312_v15 = vsel %vm299_vm0, %v311_v13, 0.0 }
  0x89   : > { %301 = vadd.xlane.f32.xlu0 %v300_v14  ;;  %p657_p3 = por %p656_p1, %p655_p9 }
  0x8b   : > { %p658_p11 = pnand %p657_p3, %p651_p12 }
  0x8d   : > { %313 = vadd.xlane.f32.xlu0 %v312_v15 }
 0x116   : > { %v302_v17 = vpop.xlane.xlu0 %301 }
 0x117   : > { %v305_v18 = vadd.f32 %v304_v16, %v302_v17 }
 0x119   : > { %v477_v20 = vmul.f32 -1.442695, %v305_v18 }
 0x11a   : > { %v314_v21 = vpop.xlane.xlu0 %313 }
 0x11b   : > { %540 = vpow2.f32 %v477_v20  ;;  %v317_v22 = vadd.f32 %v316_v19, %v314_v21 }
 0x11d   : > { %v478_v23 = vmul.f32 -1.442695, %v317_v22 }
 0x11f   : > { %542 = vpow2.f32 %v478_v23 }
 0x125   : > { %v541_v24 = vpop.eup %540 }
 0x126   : > { %v321_v25 = vadd.f32 1.0, %v541_v24 }
 0x128   : > { %544 = vrcp.f32 %v321_v25 }
 0x129   : > { %v543_v26 = vpop.eup %542 }
 0x12a   : > { %v327_v27 = vadd.f32 1.0, %v543_v26 }
 0x12c   : > { %546 = vrcp.f32 %v327_v27 }
 0x132   : > { %v545_v28 = vpop.eup %544 }
 0x133   : > { %v330_v30 = vmul.f32 %v545_v28, %v289_v4 }
 0x136   : > { %v547_v29 = vpop.eup %546 }
 0x137   : > { %v331_v31 = vmul.f32 %v547_v29, %v290_v9 }
 0x139   : > { %v332_v32 = vadd.f32 %v331_v31, %v330_v30 }
 0x13b   : > { %v333_v33 = vadd.f32 %v332_v32, %v291_v5 }
 0x13d   : > { %334 = vst.msk [vmem:[%s288_s23] sm:$0xff] %vm299_vm0, %v333_v33 }
 0x13e   : > { %661 = shalt.err (!%p658_p11)
}
 0x13f   : > { %s662_s27 = scalar_lea.hbm %s965_s7, 128  ;;  %s666_s21 = scalar_lea.hbm %s1015_s5, 256 }
 0x140   : > { %p663_p2 = scmp.ne.s32.totalorder %s965_s7, %s662_s27  ;;  %p667_p6 = scmp.lt.u32.totalorder %s965_s7, %s1015_s5 }
 0x141   : > { %p668_p7 = scmp.lt.u32.totalorder %s666_s21, %s662_s27  ;;  %p670_p13 = scmp.lt.u32.totalorder %s662_s27, %s965_s7 }
 0x142   : > { %p664_p0 = pnand %p663_p2, %p1034_p8 }
 0x143   : > { %p669_p5 = por %p668_p7, %p667_p6 }
 0x144   : > { %p665_p4 = pneg %p664_p0 }
 0x145   : > { %p671_p10 = por %p670_p13, %p669_p5 }
 0x147   : > { %p672_p12 = pnand %p671_p10, %p665_p4 }
 0x149   : > { %675 = shalt.err (!%p672_p12)
}
 0x14a   : > { %489 = dma.vmem_to_hbm [thread:$0]  (%p1034_p8), %s967_s22, 128, %s965_s7, %s336_s2  }
 0x14b PF: > { %s361_s15 = sand.u32 1, %s708_s28   ;;  %p1035_p9 = scmp.ne.s32.totalorder %s1024_s14, 0 }
 0x14c   : > { %p1036_p1 = scmp.ge.s32.totalorder %s720_s6, 2  ;;  %s362_s12 = scalar_lea.sflag [#allocation6], %s361_s15 }
 0x14e   : > { %p502_p3 = pnand %p1036_p1, %p1035_p9 }
 0x150   : > { %703 = dma.done.wait (!%p502_p3), %s362_s12, 128  }
 0x151   : > { %705 = vsyncadd (!%p502_p3), %s362_s12, 4294967168  ;;  %s1037_s19 = sld [smem:[#allocation15_spill]]  ;;  %p25_p11 = scmp.ge.s32.totalorder %s794_s8, 4  }
 0x152   : > { %s1038_s28 = smov %s712_s29  ;;  %s1039_s29 = smov %s716_s30 }
 0x153   : > { %s1041_s6 = smov %s794_s8  ;;  %27 = sbr.rel (!%p25_p11) target bundleno = 19 (0x13), region = 105 }
 0x157   : > { %s1040_s30 = smov %s1037_s19 }
 0x15a   :  { %367 = vsyncpa [#allocation5], 1 }
 0x15b   :  { %369 = vsyncpa [#allocation5 + $0x1], 1 }
 0x15c   :  { %370 = vsyncpa [#allocation8], 1 }
 0x15d   :  { %372 = vsyncpa [#allocation8 + $0x1], 1 }
 0x15e   :  { %373 = vsyncpa [#allocation6], 1 }
 0x15f   :  { %375 = vsyncpa [#allocation6 + $0x1], 1 }

</bundles_post_ra>
